<compile_context>
chip_gen: v7x
topology: tpu7x:2x2x1
jax: 0.10.0
libtpu: 0.0.40
codegen_flags: <defaults>
</compile_context>

<pallas_src>
import functools

import jax
import jax.numpy as jnp
from jax import lax
from jax.experimental import pallas as pl
from jax.experimental.pallas import tpu as pltpu

NUM_CLUSTERS = 128
_SUB = 128  # pixels per register-resident inner step


def _quantize_kernel(x_ref, c_ref, ct_ref, csq_ref, o_ref, *, sub, use_mxu_scores):
    # x_ref:   (tile_n, CH) f32  pixel tile (CH = 3, or 8 zero-padded channels
    #                            for the MXU-scores variant)
    # c_ref:   (K, 3)  f32       cluster centers (one-hot gather table)
    # ct_ref:  (CH, K) f32       centers transposed (channel rows)
    # csq_ref: (1, K)  f32       ||c_k||^2 (MXU-scores variant only)
    # o_ref:   (tile_n, 3) f32   quantized colors
    k = c_ref.shape[0]
    tile_n = x_ref.shape[0]

    # Hoisted loop invariants (Mosaic does not CSE broadcasts / iota).
    lane_idx = lax.broadcasted_iota(jnp.int32, (1, k), 1).astype(jnp.float32)
    ct = ct_ref[...]                                      # (CH, K), <= 1 vreg
    if use_mxu_scores:
        neg2ct = ct * (-2.0)                              # (CH, K)
        csq = csq_ref[...]                                # (1, K)

    def body(p, carry):
        p0 = pl.multiple_of(p * sub, sub)
        xs = x_ref[pl.ds(p0, sub), :]                     # (sub, CH)

        if use_mxu_scores:
            # argmin_k ||x - c_k||^2 == argmin_k (||c_k||^2 - 2 x.c_k); the
            # dominant multiply-adds run on the otherwise-idle MXU.
            d2 = jnp.dot(xs, neg2ct, preferred_element_type=jnp.float32) + csq
        else:
            # Direct squared differences on the VPU (matches torch.norm
            # numerics; sqrt is monotone so it is skipped).
            d2 = None
            for ch in range(3):                           # static 3-way unroll
                diff = xs[:, ch:ch + 1] - ct[ch:ch + 1, :]   # (sub,1)-(1,K)->(sub,K)
                sq = diff * diff
                d2 = sq if d2 is None else d2 + sq

        dmin = jnp.min(d2, axis=1, keepdims=True)         # (sub, 1)
        # First-index argmin over clusters (torch .min(1) tie rule).  The
        # sentinel value k can never win: dmin is an exact element of each row.
        idx = jnp.min(jnp.where(d2 <= dmin, lane_idx, float(k)),
                      axis=1, keepdims=True)              # (sub, 1), exact ints
        # Fused gather: exactly one lane matches per row, so the one-hot
        # contraction reproduces cluster_centers[idx] bit-exactly (MXU, K=128).
        onehot = (lane_idx == idx).astype(jnp.float32)    # (sub, K)
        o_ref[pl.ds(p0, sub), :] = jnp.dot(
            onehot, c_ref[...], preferred_element_type=jnp.float32
        ).astype(o_ref.dtype)
        return carry

    lax.fori_loop(0, tile_n // sub, body, 0)


@functools.partial(jax.jit, static_argnames=("tile_n", "use_mxu_scores"))
def color_quantize(x, cluster_centers, *, tile_n=None, use_mxu_scores=False):
    """x: (N, 3); cluster_centers: (K, 3) -> cluster_centers[argmin_k ||x-c_k||], (N, 3) f32."""
    n, f = x.shape
    k, fc = cluster_centers.shape
    assert f == 3 and fc == 3
    assert k % 8 == 0

    x = x.astype(jnp.float32)
    centers = cluster_centers.astype(jnp.float32)

    if use_mxu_scores:
        # Zero-pad the channel (contraction) dim to a full f32 sublane tile (8)
        # so the MXU contraction never sees implicitly-padded garbage lanes.
        ch_in = 8
        x = jnp.pad(x, ((0, 0), (0, ch_in - f)))
        ct = jnp.pad(centers.T, ((0, ch_in - f), (0, 0)))          # (8, K)
    else:
        ch_in = f
        ct = centers.T                                             # (3, K)
    csq = jnp.sum(centers * centers, axis=1, keepdims=True).T      # (1, K)

    if tile_n is None:
        # Big DMA tiles amortize the ~0.35us per-grid-step overhead, but keep
        # >=2 grid steps when possible (v7x: 2 TensorCores on the "parallel"
        # axis) and cap at 4096 so the lane-padded (tile_n, 128) VMEM windows
        # stay ~8 MiB double-buffered (under the v5e 16 MiB scoped default).
        half = -(-n // 2)
        tile_n = min(4096, max(_SUB, -(-half // _SUB) * _SUB))
    assert tile_n % _SUB == 0, "tile_n must be a multiple of 128"

    n_pad = -(-n // tile_n) * tile_n
    if n_pad != n:
        x = jnp.pad(x, ((0, n_pad - n), (0, 0)))

    kernel = functools.partial(_quantize_kernel, sub=_SUB,
                               use_mxu_scores=use_mxu_scores)

    out = pl.pallas_call(
        kernel,
        out_shape=jax.ShapeDtypeStruct((n_pad, 3), jnp.float32),
        grid_spec=pltpu.PrefetchScalarGridSpec(
            num_scalar_prefetch=0,
            grid=(n_pad // tile_n,),
            in_specs=[
                pl.BlockSpec((tile_n, ch_in), lambda i: (i, 0)),   # pixel tile
                pl.BlockSpec((k, fc), lambda i: (0, 0)),           # centers (gather)
                pl.BlockSpec((ch_in, k), lambda i: (0, 0)),        # centers^T rows
                pl.BlockSpec((1, k), lambda i: (0, 0)),            # ||c||^2
            ],
            out_specs=pl.BlockSpec((tile_n, fc), lambda i: (i, 0)),
        ),
        compiler_params=pltpu.CompilerParams(
            dimension_semantics=("parallel",)),                    # v7x megacore
    )(x, centers, ct, csq)

    return out[:n]


def _reference(x, centers):
    d = jnp.linalg.norm(x[:, None, :] - centers[None, :, :], axis=2)
    return centers[jnp.argmin(d, axis=1)]


if __name__ == "__main__":
    key = jax.random.PRNGKey(0)
    k_c, k_x = jax.random.split(key)

    # Matches nn.Parameter(torch.randn(128, 3)); 1000 RGB pixels exercises the
    # ragged-N padding path and a 2-step grid (tile_n auto-picks 512 here).
    cluster_centers = jax.random.normal(k_c, (NUM_CLUSTERS, 3), dtype=jnp.float32)
    x = jax.random.normal(k_x, (1000, 3), dtype=jnp.float32)

    ref = _reference(x, cluster_centers)

    # Default (exact) path: direct squared differences, torch tie rule.
    out = jax.block_until_ready(color_quantize(x, cluster_centers))
    assert out.shape == (1000, 3) and out.dtype == jnp.float32
    assert bool(jnp.allclose(out, ref, atol=1e-6)), "exact path mismatch vs reference"

    # MXU-scores variant (review item 4): near-exact ties may resolve to a
    # different-but-equidistant center, so validate by achieved distance.
    out_mxu = jax.block_until_ready(
        color_quantize(x, cluster_centers, use_mxu_scores=True))
    d_mxu = jnp.sum((x - out_mxu) ** 2, axis=1)
    d_ref = jnp.sum((x - ref) ** 2, axis=1)
    assert bool(jnp.all(d_mxu <= d_ref + 1e-4)), "mxu path picked a worse center"

    print("KERNEL_OK")
</pallas_src>

<mosaic_0001>
module attributes {stable_mosaic.version = 11 : i64} {
  func.func @_quantize_kernel(%arg0: i32, %arg1: memref<512x3xf32, #tpu.memory_space<vmem>>, %arg2: memref<128x3xf32, #tpu.memory_space<vmem>>, %arg3: memref<3x128xf32, #tpu.memory_space<vmem>>, %arg4: memref<1x128xf32, #tpu.memory_space<vmem>>, %arg5: memref<512x3xf32, #tpu.memory_space<vmem>>) attributes {dimension_semantics = [#tpu.dimension_semantics<parallel>], iteration_bounds = array<i64: 2>, scalar_prefetch = 0 : i64, scratch_operands = 0 : i64, tpu.core_type = #tpu.core_type<tc>, window_params = [{transform_indices = @transform_0, window_bounds = array<i64: 512, 3>}, {pipeline_mode = #tpu.pipeline_mode<synchronous>, transform_indices = @transform_1, window_bounds = array<i64: 128, 3>}, {pipeline_mode = #tpu.pipeline_mode<synchronous>, transform_indices = @transform_2, window_bounds = array<i64: 3, 128>}, {pipeline_mode = #tpu.pipeline_mode<synchronous>, transform_indices = @transform_3, window_bounds = array<i64: 1, 128>}, {transform_indices = @transform_4, window_bounds = array<i64: 512, 3>}]} {
    %0 = tpu.iota {dimensions = array<i32: 1>} : vector<1x128xi32>
    %1 = arith.sitofp %0 : vector<1x128xi32> to vector<1x128xf32>
    %c0 = arith.constant 0 : index
    %c0_0 = arith.constant 0 : index
    %2 = vector.load %arg3[%c0, %c0_0] : memref<3x128xf32, #tpu.memory_space<vmem>>, vector<3x128xf32>
    %c0_i32 = arith.constant 0 : i32
    %c4_i32 = arith.constant 4 : i32
    %3 = arith.addi %c0_i32, %c4_i32 : i32
    %c1_i32 = arith.constant 1 : i32
    scf.for %arg6 = %c0_i32 to %3 step %c1_i32  : i32 {
      %c128_i32 = arith.constant 128 : i32
      %4 = arith.muli %arg6, %c128_i32 : i32
      %5 = tpu.assume_multiple %4, 128 : i32
      %6 = arith.index_cast %5 : i32 to index
      %c0_2 = arith.constant 0 : index
      %7 = vector.load %arg1[%6, %c0_2] : memref<512x3xf32, #tpu.memory_space<vmem>>, vector<128x3xf32>
      %8 = vector.extract_strided_slice %7 {offsets = [0, 0], sizes = [128, 1], strides = [1, 1]} : vector<128x3xf32> to vector<128x1xf32>
      %9 = vector.extract_strided_slice %2 {offsets = [0, 0], sizes = [1, 128], strides = [1, 1]} : vector<3x128xf32> to vector<1x128xf32>
      %10 = vector.broadcast %8 : vector<128x1xf32> to vector<128x128xf32>
      %11 = vector.broadcast %9 : vector<1x128xf32> to vector<128x128xf32>
      %12 = arith.subf %10, %11 : vector<128x128xf32>
      %13 = arith.mulf %12, %12 : vector<128x128xf32>
      %14 = vector.extract_strided_slice %7 {offsets = [0, 1], sizes = [128, 1], strides = [1, 1]} : vector<128x3xf32> to vector<128x1xf32>
      %15 = vector.extract_strided_slice %2 {offsets = [1, 0], sizes = [1, 128], strides = [1, 1]} : vector<3x128xf32> to vector<1x128xf32>
      %16 = vector.broadcast %14 : vector<128x1xf32> to vector<128x128xf32>
      %17 = vector.broadcast %15 : vector<1x128xf32> to vector<128x128xf32>
      %18 = arith.subf %16, %17 : vector<128x128xf32>
      %19 = arith.mulf %18, %18 : vector<128x128xf32>
      %20 = arith.addf %13, %19 : vector<128x128xf32>
      %21 = vector.extract_strided_slice %7 {offsets = [0, 2], sizes = [128, 1], strides = [1, 1]} : vector<128x3xf32> to vector<128x1xf32>
      %22 = vector.extract_strided_slice %2 {offsets = [2, 0], sizes = [1, 128], strides = [1, 1]} : vector<3x128xf32> to vector<1x128xf32>
      %23 = vector.broadcast %21 : vector<128x1xf32> to vector<128x128xf32>
      %24 = vector.broadcast %22 : vector<1x128xf32> to vector<128x128xf32>
      %25 = arith.subf %23, %24 : vector<128x128xf32>
      %26 = arith.mulf %25, %25 : vector<128x128xf32>
      %27 = arith.addf %20, %26 : vector<128x128xf32>
      %cst = arith.constant dense<0x7F800000> : vector<128xf32>
      %28 = vector.multi_reduction <minimumf>, %27, %cst [1] : vector<128x128xf32> to vector<128xf32>
      %29 = vector.shape_cast %28 : vector<128xf32> to vector<128x1xf32>
      %30 = vector.broadcast %29 : vector<128x1xf32> to vector<128x128xf32>
      %31 = arith.cmpf ole, %27, %30 : vector<128x128xf32>
      %cst_3 = arith.constant 1.280000e+02 : f32
      %32 = vector.shape_cast %1 : vector<1x128xf32> to vector<1x128xf32>
      %33 = vector.broadcast %32 : vector<1x128xf32> to vector<128x128xf32>
      %34 = vector.broadcast %cst_3 : f32 to vector<128x128xf32>
      %35 = arith.select %31, %33, %34 : vector<128x128xi1>, vector<128x128xf32>
      %cst_4 = arith.constant dense<0x7F800000> : vector<128xf32>
      %36 = vector.multi_reduction <minimumf>, %35, %cst_4 [1] : vector<128x128xf32> to vector<128xf32>
      %37 = vector.shape_cast %36 : vector<128xf32> to vector<128x1xf32>
      %38 = vector.broadcast %1 : vector<1x128xf32> to vector<128x128xf32>
      %39 = vector.broadcast %37 : vector<128x1xf32> to vector<128x128xf32>
      %40 = arith.cmpf oeq, %38, %39 : vector<128x128xf32>
      %41 = arith.extui %40 : vector<128x128xi1> to vector<128x128xi32>
      %42 = arith.sitofp %41 : vector<128x128xi32> to vector<128x128xf32>
      %c0_5 = arith.constant 0 : index
      %c0_6 = arith.constant 0 : index
      %43 = vector.load %arg2[%c0_5, %c0_6] : memref<128x3xf32, #tpu.memory_space<vmem>>, vector<128x3xf32>
      %cst_7 = arith.constant dense<0.000000e+00> : vector<128x3xf32>
      %44 = tpu.matmul %42, %43, %cst_7 {dimension_numbers = #tpu.dot_dimension_numbers<[1], [0], [0], [1], [0, 0, 1, 1], [], []>} : vector<128x128xf32>, vector<128x3xf32>, vector<128x3xf32> -> vector<128x3xf32>
      %45 = arith.index_cast %5 : i32 to index
      %c0_8 = arith.constant 0 : index
      %46 = vector.load %arg5[%45, %c0_8] : memref<512x3xf32, #tpu.memory_space<vmem>>, vector<128x3xf32>
      tpu.vector_store %arg5[%45, %c0_8], %44 {strides = array<i32>} : memref<512x3xf32, #tpu.memory_space<vmem>>, vector<128x3xf32>,
    }
    %c4_i32_1 = arith.constant 4 : i32
    return
  }
  func.func @transform_0(%arg0: i32) -> (i32, i32) {
    %c0_i32 = arith.constant 0 : i32
    %c0_i32_0 = arith.constant 0 : i32
    return %arg0, %c0_i32 : i32, i32
  }
  func.func @transform_1(%arg0: i32) -> (i32, i32) {
    %c0_i32 = arith.constant 0 : i32
    %c0_i32_0 = arith.constant 0 : i32
    %c0_i32_1 = arith.constant 0 : i32
    return %c0_i32, %c0_i32_0 : i32, i32
  }
  func.func @transform_2(%arg0: i32) -> (i32, i32) {
    %c0_i32 = arith.constant 0 : i32
    %c0_i32_0 = arith.constant 0 : i32
    %c0_i32_1 = arith.constant 0 : i32
    return %c0_i32, %c0_i32_0 : i32, i32
  }
  func.func @transform_3(%arg0: i32) -> (i32, i32) {
    %c0_i32 = arith.constant 0 : i32
    %c0_i32_0 = arith.constant 0 : i32
    %c0_i32_1 = arith.constant 0 : i32
    return %c0_i32, %c0_i32_0 : i32, i32
  }
  func.func @transform_4(%arg0: i32) -> (i32, i32) {
    %c0_i32 = arith.constant 0 : i32
    %c0_i32_0 = arith.constant 0 : i32
    return %arg0, %c0_i32 : i32, i32
  }
}

</mosaic_0001>

<bundles_post_ra>
// kernel: color_quantize.1
= control target key start
LH: loop header
LB: loop body
LE: loop exit
PB: predicated region body
PF: predicated region fallthrough
CT: control target
= control target key end

     0   :  { %s1232_s15 = smov 0   ;;  %s1570_s0 = inlined_call_operand.vmem [shape: f32[1024,3], index: 0, kind: input, shape index: {}]   ;;  %s1571_s1 = inlined_call_operand.vmem [shape: f32[128,3], index: 1, kind: input, shape index: {}]   ;;  %s1572_s2 = inlined_call_operand.vmem [shape: f32[3,128], index: 2, kind: input, shape index: {}]   ;;  %s1573_s3 = inlined_call_operand.vmem [shape: f32[1,128], index: 3, kind: input, shape index: {}]   ;;  %s1574_s4 = inlined_call_operand.vmem [shape: f32[1024,3], index: 4, kind: output, shape index: {}]  }
   0x1 LB: > { %s965_s16 = sadd.s32 4294967295, %s1197_s15   ;;  %p969_p0 = scmp.ge.s32.totalorder %s1197_s15, 1  ;;  %s1197_s15 = sphi %s1232_s15, %s14_s15  }
   0x2   : > { %p163_p1 = scmp.lt.s32.totalorder %s1197_s15, 3 }
   0x4   : > { %p164_p2 = pnand %p969_p0, %p163_p1 }
   0x5   : > { %s970_s17 = sshll.u32 (!%p164_p2), %s965_s16, 6  ;;  %v201_v0 = vlaneseq (!%p164_p2)  ;;  %v1243_v1 = vld [vmem:[%s1572_s2] sm:$0x7] (!%p164_p2)  ;;  %s1258_s26 = smov (!%p164_p2), 0  }
   0x6   : > { %167 = sbr.rel (%p164_p2) target bundleno = 784 (0x310), region = 36  ;;  %p190_p3 = scmp.lt.s32.totalorder (!%p164_p2), %s970_s17, 127 }
   0x7   : > { %v202_v2 = vand.u32 (!%p164_p2), 127, %v201_v0 }
   0x9   : > { %v1246_v3 = vcvt.s32.f32 (!%p164_p2), %v202_v2 }
   0xd   : > { %s1576_s17 = smov (!%p190_p3, %s970_s17), 127 }
   0xe   : > { %s971_s19 = sshll.u32 %s1576_s17, 3 }
   0xf   : > { %s1251_s22 = scalar_lea.vmem %s1570_s0, %s971_s19  ;;  %s1256_s25 = scalar_lea.vmem %s1574_s4, %s971_s19 }
  0x10 LB: >> { %v1203_v4 = vmov 1   ;;  %v1204_v5 = vmov 0   ;;  %s974_s27 = sshll.u32 %s1201_s26, 7  ;;  %v1205_v13 = vmov 2   ;;  %v310_v31 = vshrl.u32 %v201_v0, 7  ;;  %s210_s26 = sadd.s32 1, %s1201_s26   ;;  %s1201_s26 = sphi %s1258_s26, %s210_s26  }
  0x11   : >> { %1166 = vset.pattern.permute.xlu1 %v1203_v4  ;;  %1165 = vset.pattern.permute.xlu0 %v1204_v5  ;;  %s1269_s28 = scalar_lea.vmem %s1251_s22, %s974_s27  ;;  %s1530_s13 = scalar_lea.vmem %s1256_s25, %s974_s27 }
  0x12   : >> { %v213_v6 = vld [vmem:[%s1269_s28] sm:$0xff]  ;;  %v214_v8 = vld [vmem:[%s1269_s28 + $0x8] sm:$0xff]  ;;  %v215_v10 = vld [vmem:[%s1269_s28 + $0x10] sm:$0xff]  ;;  %v411_v33 = vsub.s32 1, %v310_v31  ;;  %v311_v34 = vsub.s32 0, %v310_v31  ;;  %v527_v37 = vsub.s32 2, %v310_v31 }
  0x13   : >> { %346 = vperm.xlu1 %1166, %v213_v6   ;;  %231 = vperm.xlu0 %1165, %v213_v6   ;;  %v221_v7 = vld [vmem:[%s1269_s28 + $0x40] sm:$0xff]  ;;  %v222_v9 = vld [vmem:[%s1269_s28 + $0x48] sm:$0xff]  ;;  %v219_v14 = vld [vmem:[%s1269_s28 + $0x30] sm:$0xff]  ;;  %p207_p4 = scmp.ge.s32.totalorder %s210_s26, 4  }
  0x14   : >> { %v225_v11 = vld [vmem:[%s1269_s28 + $0x60] sm:$0xff]  ;;  %v218_v12 = vld [vmem:[%s1269_s28 + $0x28] sm:$0xff]  ;;  %v223_v15 = vld [vmem:[%s1269_s28 + $0x50] sm:$0xff]  ;;  %v1313_v38 = vrot.slane %v1243_v1, %v411_v33  ;;  %v1316_v39 = vrot.slane %v1243_v1, %v311_v34  ;;  %v1321_v42 = vrot.slane %v1243_v1, %v527_v37 }
  0x15   : >> { %v216_v16 = vld [vmem:[%s1269_s28 + $0x18] sm:$0xff]  ;;  %v227_v17 = vld [vmem:[%s1269_s28 + $0x70] sm:$0xff]  ;;  %v217_v20 = vld [vmem:[%s1269_s28 + $0x20] sm:$0xff] }
  0x16   : >> { %v224_v18 = vld [vmem:[%s1269_s28 + $0x58] sm:$0xff]  ;;  %v226_v22 = vld [vmem:[%s1269_s28 + $0x68] sm:$0xff] }
  0x17   : >> { %378 = vperm.xlu1 %1166, %v221_v7   ;;  %271 = vperm.xlu0 %1165, %v221_v7   ;;  %v220_v19 = vld [vmem:[%s1269_s28 + $0x38] sm:$0xff] }
  0x18   : >> { %v228_v21 = vld [vmem:[%s1269_s28 + $0x78] sm:$0xff] }
  0x1b   : >> { %1167 = vset.pattern.permute.xlu1 %v1204_v5  ;;  %236 = vperm.xlu0 %1165, %v214_v8  }
  0x1c   : >> { %276 = vperm.xlu1 %1167, %v222_v9  }
  0x1f   : >> { %241 = vperm.xlu0 %1165, %v215_v10  }
  0x20   : >> { %1168 = vset.pattern.permute.xlu1 %v1203_v4 }
  0x21   : >> { %382 = vperm.xlu1 %1168, %v222_v9  }
  0x23   : >> { %291 = vperm.xlu0 %1165, %v225_v11  }
  0x25   : >> { %1169 = vset.pattern.permute.xlu1 %v1205_v13 }
  0x26   : >> { %462 = vperm.xlu1 %1169, %v213_v6  }
  0x27   : >> { %256 = vperm.xlu0 %1165, %v218_v12  }
  0x2a   : >> { %466 = vperm.xlu1 %1169, %v214_v8  }
  0x2b   : >> { %261 = vperm.xlu0 %1165, %v219_v14  }
  0x2e   : >> { %498 = vperm.xlu1 %1169, %v222_v9  }
  0x2f   : >> { %1180 = vset.pattern.permute.xlu0 %v1203_v4 }
  0x30   : >> { %350 = vperm.xlu0 %1180, %v214_v8  }
  0x32   : >> { %1170 = vset.pattern.permute.xlu1 %v1204_v5 }
  0x33   : >> { %281 = vperm.xlu1 %1170, %v223_v15  }
  0x34   : >> { %386 = vperm.xlu0 %1180, %v223_v15  }
  0x37   : >> { %1171 = vset.pattern.permute.xlu1 %v1203_v4 }
  0x38   : >> { %354 = vperm.xlu1 %1171, %v215_v10   ;;  %358 = vperm.xlu0 %1180, %v216_v16  }
  0x3c   : >> { %1172 = vset.pattern.permute.xlu1 %v1204_v5  ;;  %366 = vperm.xlu0 %1180, %v218_v12  }
  0x3d   : >> { %246 = vperm.xlu1 %1172, %v216_v16  }
  0x40   : >> { %402 = vperm.xlu0 %1180, %v227_v17  }
  0x41   : >> { %286 = vperm.xlu1 %1172, %v224_v18  }
  0x44   : >> { %374 = vperm.xlu0 %1180, %v220_v19  }
  0x45   : >> { %1173 = vset.pattern.permute.xlu1 %v1203_v4 }
  0x46   : >> { %390 = vperm.xlu1 %1173, %v224_v18  }
  0x48   : >> { %1184 = vset.pattern.permute.xlu0 %v1205_v13 }
  0x49   : >> { %494 = vperm.xlu0 %1184, %v221_v7  }
  0x4a   : >> { %1174 = vset.pattern.permute.xlu1 %v1205_v13 }
  0x4b   : >> { %502 = vperm.xlu1 %1174, %v223_v15  }
  0x4d   : >> { %470 = vperm.xlu0 %1184, %v215_v10  }
  0x4f   : >> { %474 = vperm.xlu1 %1174, %v216_v16  }
  0x51   : >> { %506 = vperm.xlu0 %1184, %v224_v18  }
  0x53   : >> { %1175 = vset.pattern.permute.xlu1 %v1204_v5 }
  0x54   : >> { %251 = vperm.xlu1 %1175, %v217_v20  }
  0x55   : >> { %510 = vperm.xlu0 %1184, %v225_v11  }
  0x58   : >> { %1176 = vset.pattern.permute.xlu1 %v1203_v4 }
  0x59   : >> { %362 = vperm.xlu1 %1176, %v217_v20   ;;  %486 = vperm.xlu0 %1184, %v219_v14  }
  0x5d   : >> { %394 = vperm.xlu1 %1176, %v225_v11   ;;  %522 = vperm.xlu0 %1184, %v228_v21  }
  0x61   : >> { %1177 = vset.pattern.permute.xlu1 %v1204_v5 }
  0x62   : >> { %296 = vperm.xlu1 %1177, %v226_v22  }
  0x66   : >> { %1178 = vset.pattern.permute.xlu1 %v1203_v4 }
  0x67   : >> { %398 = vperm.xlu1 %1178, %v226_v22  }
  0x6b   : >> { %1179 = vset.pattern.permute.xlu1 %v1205_v13 }
  0x6c   : >> { %478 = vperm.xlu1 %1179, %v217_v20  }
  0x70   : >> { %482 = vperm.xlu1 %1179, %v218_v12  }
  0x74   : >> { %514 = vperm.xlu1 %1179, %v226_v22  }
  0x78   : >> { %1181 = vset.pattern.permute.xlu1 %v1204_v5 }
  0x79   : >> { %301 = vperm.xlu1 %1181, %v227_v17  }
  0x7d   : >> { %1182 = vset.pattern.permute.xlu1 %v1203_v4 }
  0x7e   : >> { %370 = vperm.xlu1 %1182, %v219_v14  }
  0x82   : >> { %1183 = vset.pattern.permute.xlu1 %v1204_v5 }
  0x83   : >> { %266 = vperm.xlu1 %1183, %v220_v19  }
  0x87   : >> { %306 = vperm.xlu1 %1183, %v228_v21  }
  0x8b   : >> { %1185 = vset.pattern.permute.xlu1 %v1203_v4 }
  0x8c   : >> { %406 = vperm.xlu1 %1185, %v228_v21  }
  0x90   : >> { %1186 = vset.pattern.permute.xlu1 %v1205_v13 }
  0x91   : >> { %518 = vperm.xlu1 %1186, %v227_v17  }
  0x92   : >> { %v347_v23 = vpop.permute.xlu1 %346  ;;  %v232_v24 = vpop.permute.xlu0 %231 }
  0x93   : >> { %v413_v43 = vsub.f32 %v347_v23, %v1313_v38  ;;  %v313_v44 = vsub.f32 %v232_v24, %v1316_v39 }
  0x95   : >> { %490 = vperm.xlu1 %1186, %v220_v19   ;;  %v429_v48 = vmul.f32 %v413_v43, %v413_v43  ;;  %v329_v49 = vmul.f32 %v313_v44, %v313_v44 }
  0x96   : >> { %v379_v25 = vpop.permute.xlu1 %378  ;;  %v272_v26 = vpop.permute.xlu0 %271 }
  0x97   : >> { %v445_v56 = vadd.f32 %v429_v48, %v329_v49  ;;  %v421_v8 = vsub.f32 %v379_v25, %v1313_v38  ;;  %v321_v9 = vsub.f32 %v272_v26, %v1316_v39 }
  0x99   : >> { %v437_v16 = vmul.f32 %v421_v8, %v421_v8  ;;  %v337_v17 = vmul.f32 %v321_v9, %v321_v9 }
  0x9a   : >> { %v237_v27 = vpop.permute.xlu0 %236 }
  0x9b   : >> { %v277_v28 = vpop.permute.xlu1 %276  ;;  %v314_v11 = vsub.f32 %v237_v27, %v1316_v39  ;;  %v453_v24 = vadd.f32 %v437_v16, %v337_v17 }
  0x9c   : >> { %v322_v52 = vsub.f32 %v277_v28, %v1316_v39 }
  0x9d   : >> { %v330_v18 = vmul.f32 %v314_v11, %v314_v11 }
  0x9e   : >> { %v242_v29 = vpop.permute.xlu0 %241  ;;  %v338_v58 = vmul.f32 %v322_v52, %v322_v52 }
  0x9f   : >> { %v315_v25 = vsub.f32 %v242_v29, %v1316_v39 }
  0xa0   : >> { %v383_v30 = vpop.permute.xlu1 %382 }
  0xa1   : >> { %v422_v50 = vsub.f32 %v383_v30, %v1313_v38  ;;  %v331_v29 = vmul.f32 %v315_v25, %v315_v25 }
  0xa2   : >> { %v1308_v32 = vpop.permute.xlu0 %291 }
  0xa3   : >> { %v438_v57 = vmul.f32 %v422_v50, %v422_v50  ;;  %v325_v16 = vsub.f32 %v1308_v32, %v1316_v39 }
  0xa5   : >> { %v463_v35 = vpop.permute.xlu1 %462  ;;  %v454_v63 = vadd.f32 %v438_v57, %v338_v58 }
  0xa6   : >> { %v1310_v36 = vpop.permute.xlu0 %256  ;;  %v529_v46 = vsub.f32 %v463_v35, %v1321_v42 }
  0xa8   : >> { %v545_v53 = vmul.f32 %v529_v46, %v529_v46 }
  0xa9   : >> { %v467_v40 = vpop.permute.xlu1 %466 }
  0xaa   : >> { %v1318_v41 = vpop.permute.xlu0 %261  ;;  %v1329_v62 = vadd.f32 %v545_v53, %v445_v56  ;;  %v530_v26 = vsub.f32 %v467_v40, %v1321_v42 }
  0xac   : >> { %v546_v40 = vmul.f32 %v530_v26, %v530_v26 }
  0xad   : >> { %v499_v45 = vpop.permute.xlu1 %498 }
  0xae   : >> { %v538_v54 = vsub.f32 %v499_v45, %v1321_v42 }
  0xaf   : >> { %v351_v47 = vpop.permute.xlu0 %350 }
  0xb0   : >> { %v554_v59 = vmul.f32 %v538_v54, %v538_v54  ;;  %v414_v12 = vsub.f32 %v351_v47, %v1313_v38 }
  0xb2   : >> { %v282_v51 = vpop.permute.xlu1 %281  ;;  %v1334_v4 = vadd.f32 %v554_v59, %v454_v63  ;;  %v430_v19 = vmul.f32 %v414_v12, %v414_v12 }
  0xb3   : >> { %v387_v55 = vpop.permute.xlu0 %386  ;;  %v323_v13 = vsub.f32 %v282_v51, %v1316_v39 }
  0xb4   : >> { %v423_v14 = vsub.f32 %v387_v55, %v1313_v38  ;;  %v446_v34 = vadd.f32 %v430_v19, %v330_v18 }
  0xb5   : >> { %v339_v20 = vmul.f32 %v323_v13, %v323_v13 }
  0xb6   : >> { %v439_v21 = vmul.f32 %v423_v14, %v423_v14  ;;  %v1362_v54 = vadd.f32 %v546_v40, %v446_v34 }
  0xb7   : >> { %v355_v60 = vpop.permute.xlu1 %354  ;;  %v359_v61 = vpop.permute.xlu0 %358 }
  0xb8   : >> { %v415_v28 = vsub.f32 %v355_v60, %v1313_v38  ;;  %v455_v35 = vadd.f32 %v439_v21, %v339_v20  ;;  %v416_v47 = vsub.f32 %v359_v61, %v1313_v38  ;;  %v341_v20 = vmul.f32 %v325_v16, %v325_v16 }
  0xb9   : >> { %577 = vmin.xlane.f32.xlu1 %v1329_v62 }
  0xba   : >> { %v431_v49 = vmul.f32 %v415_v28, %v415_v28  ;;  %v432_v59 = vmul.f32 %v416_v47, %v416_v47  ;;  %v318_v28 = vsub.f32 %v1310_v36, %v1316_v39 }
  0xbb   : >> { %v1332_v2 = vpop.permute.xlu0 %366 }
  0xbc   : >> { %v247_v5 = vpop.permute.xlu1 %246  ;;  %v447_v60 = vadd.f32 %v431_v49, %v331_v29 }
  0xbd   : >> { %595 = vmin.xlane.f32.xlu1 %v1334_v4  ;;  %v316_v50 = vsub.f32 %v247_v5, %v1316_v39 }
  0xbf   : >> { %v1337_v6 = vpop.permute.xlu0 %402  ;;  %v332_v61 = vmul.f32 %v316_v50, %v316_v50 }
  0xc0   : >> { %v287_v7 = vpop.permute.xlu1 %286 }
  0xc1   : >> { %v324_v43 = vsub.f32 %v287_v7, %v1316_v39  ;;  %v448_v12 = vadd.f32 %v432_v59, %v332_v61  ;;  %v319_v61 = vsub.f32 %v1318_v41, %v1316_v39  ;;  %v427_v41 = vsub.f32 %v1337_v6, %v1313_v38 }
  0xc3   : >> { %v1341_v10 = vpop.permute.xlu0 %374  ;;  %v340_v55 = vmul.f32 %v324_v43, %v324_v43 }
  0xc5   : >> { %v391_v15 = vpop.permute.xlu1 %390 }
  0xc6   : >> { %v424_v30 = vsub.f32 %v391_v15, %v1313_v38 }
  0xc8   : >> { %v495_v22 = vpop.permute.xlu0 %494  ;;  %v440_v51 = vmul.f32 %v424_v30, %v424_v30  ;;  %v418_v30 = vsub.f32 %v1332_v2, %v1313_v38 }
  0xc9   : >> { %v537_v23 = vsub.f32 %v495_v22, %v1321_v42 }
  0xca   : >> { %v503_v27 = vpop.permute.xlu1 %502  ;;  %v456_v63 = vadd.f32 %v440_v51, %v340_v55  ;;  %v434_v43 = vmul.f32 %v418_v30, %v418_v30  ;;  %v420_v30 = vsub.f32 %v1341_v10, %v1313_v38 }
  0xcb   : >> { %v553_v31 = vmul.f32 %v537_v23, %v537_v23  ;;  %v539_v33 = vsub.f32 %v503_v27, %v1321_v42 }
  0xcc   : >> { %v471_v37 = vpop.permute.xlu0 %470 }
  0xcd   : >> { %v555_v44 = vmul.f32 %v539_v33, %v539_v33  ;;  %v531_v45 = vsub.f32 %v471_v37, %v1321_v42  ;;  %v1355_v46 = vadd.f32 %v553_v31, %v453_v24  ;;  %v334_v37 = vmul.f32 %v318_v28, %v318_v28 }
  0xce   : >> { %v475_v48 = vpop.permute.xlu1 %474  ;;  %v443_v28 = vmul.f32 %v427_v41, %v427_v41 }
  0xcf   : >> { %593 = vmin.xlane.f32.xlu0 %v1355_v46  ;;  %v1360_v52 = vadd.f32 %v555_v44, %v455_v35  ;;  %v547_v56 = vmul.f32 %v531_v45, %v531_v45  ;;  %v532_v57 = vsub.f32 %v475_v48, %v1321_v42  ;;  %v450_v49 = vadd.f32 %v434_v43, %v334_v37 }
  0xd0   : >> { %v507_v53 = vpop.permute.xlu0 %506 }
  0xd1   : >> { %v540_v58 = vsub.f32 %v507_v53, %v1321_v42  ;;  %597 = vmin.xlane.f32.xlu1 %v1360_v52  ;;  %v548_v8 = vmul.f32 %v532_v57, %v532_v57  ;;  %v1368_v9 = vadd.f32 %v547_v56, %v447_v60 }
  0xd3   : >> { %v556_v5 = vmul.f32 %v540_v58, %v540_v58  ;;  %v252_v7 = vpop.permute.xlu1 %251  ;;  %579 = vmin.xlane.f32.xlu0 %v1362_v54  ;;  %v1374_v15 = vadd.f32 %v548_v8, %v448_v12  ;;  %v335_v12 = vmul.f32 %v319_v61, %v319_v61  ;;  %v726_v61 = vld [vmem:[%s1571_s1 + $0x28] sm:$0xff] }
  0xd4   : >> { %v511_v14 = vpop.permute.xlu0 %510  ;;  %v317_v32 = vsub.f32 %v252_v7, %v1316_v39 }
  0xd5   : >> { %v1370_v11 = vadd.f32 %v556_v5, %v456_v63  ;;  %v541_v17 = vsub.f32 %v511_v14, %v1321_v42 }
  0xd6   : >> { %v333_v34 = vmul.f32 %v317_v32, %v317_v32 }
  0xd7   : >> { %581 = vmin.xlane.f32.xlu0 %v1368_v9  ;;  %599 = vmin.xlane.f32.xlu1 %v1370_v11  ;;  %v557_v22 = vmul.f32 %v541_v17, %v541_v17 }
  0xd8   : >> { %v363_v13 = vpop.permute.xlu1 %362  ;;  %v487_v63 = vpop.permute.xlu0 %486 }
  0xd9   : >> { %v417_v26 = vsub.f32 %v363_v13, %v1313_v38  ;;  %v535_v7 = vsub.f32 %v487_v63, %v1321_v42 }
  0xdb   : >> { %583 = vmin.xlane.f32.xlu0 %v1374_v15  ;;  %v433_v31 = vmul.f32 %v417_v26, %v417_v26  ;;  %v551_v14 = vmul.f32 %v535_v7, %v535_v7 }
  0xdc   : >> { %v395_v18 = vpop.permute.xlu1 %394 }
  0xdd   : >> { %v425_v19 = vsub.f32 %v395_v18, %v1313_v38  ;;  %v449_v44 = vadd.f32 %v433_v31, %v333_v34 }
  0xdf   : >> { %v441_v21 = vmul.f32 %v425_v19, %v425_v19 }
  0xe1   : >> { %v457_v23 = vadd.f32 %v441_v21, %v341_v20  ;;  %v297_v24 = vpop.permute.xlu1 %296 }
  0xe2   : >> { %v326_v47 = vsub.f32 %v297_v24, %v1316_v39  ;;  %v523_v24 = vpop.permute.xlu0 %522 }
  0xe3   : >> { %v1381_v25 = vadd.f32 %v557_v22, %v457_v23  ;;  %v544_v34 = vsub.f32 %v523_v24, %v1321_v42  ;;  %v733_v24 = vld [vmem:[%s1571_s1 + $0x60] sm:$0xff] }
  0xe4   : >> { %v342_v53 = vmul.f32 %v326_v47, %v326_v47 }
  0xe5   : >> { %601 = vmin.xlane.f32.xlu1 %v1381_v25  ;;  %v560_v47 = vmul.f32 %v544_v34, %v544_v34 }
  0xe6   : >> { %v399_v27 = vpop.permute.xlu1 %398 }
  0xe7   : >> { %v426_v45 = vsub.f32 %v399_v27, %v1313_v38 }
  0xe9   : >> { %v442_v2 = vmul.f32 %v426_v45, %v426_v45  ;;  %v436_v45 = vmul.f32 %v420_v30, %v420_v30 }
  0xeb   : >> { %v479_v33 = vpop.permute.xlu1 %478  ;;  %v458_v57 = vadd.f32 %v442_v2, %v342_v53  ;;  %v721_v2 = vld [vmem:[%s1571_s1] sm:$0xff]  ;;  %v724_v53 = vld [vmem:[%s1571_s1 + $0x18] sm:$0xff] }
  0xec   : >> { %v533_v35 = vsub.f32 %v479_v33, %v1321_v42 }
  0xee   : >> { %v549_v29 = vmul.f32 %v533_v35, %v533_v35 }
  0xef   : >> { %v483_v40 = vpop.permute.xlu1 %482 }
  0xf0   : >> { %v534_v48 = vsub.f32 %v483_v40, %v1321_v42  ;;  %v1394_v36 = vadd.f32 %v549_v29, %v449_v44 }
  0xf2   : >> { %v550_v50 = vmul.f32 %v534_v48, %v534_v48  ;;  %585 = vmin.xlane.f32.xlu0 %v1394_v36 }
  0xf3   : >> { %v515_v51 = vpop.permute.xlu1 %514 }
  0xf4   : >> { %v542_v55 = vsub.f32 %v515_v51, %v1321_v42  ;;  %v1398_v56 = vadd.f32 %v550_v50, %v450_v49  ;;  %v723_v50 = vld [vmem:[%s1571_s1 + $0x10] sm:$0xff] }
  0xf6   : >> { %v558_v58 = vmul.f32 %v542_v55, %v542_v55  ;;  %587 = vmin.xlane.f32.xlu0 %v1398_v56  ;;  %v1101_v55 = vpack.c.bf16 %v724_v53, %v723_v50 }
  0xf8   : >> { %v302_v59 = vpop.permute.xlu1 %301  ;;  %v1401_v60 = vadd.f32 %v558_v58, %v458_v57 }
  0xf9   : >> { %v327_v20 = vsub.f32 %v302_v59, %v1316_v39  ;;  %v725_v59 = vld [vmem:[%s1571_s1 + $0x20] sm:$0xff] }
  0xfa   : >> { %603 = vmin.xlane.f32.xlu1 %v1401_v60  ;;  %v1105_v63 = vpack.c.bf16 %v726_v61, %v725_v59 }
  0xfb   : >> { %v343_v23 = vmul.f32 %v327_v20, %v327_v20  ;;  %v732_v20 = vld [vmem:[%s1571_s1 + $0x58] sm:$0xff] }
  0xfd   : >> { %v371_v5 = vpop.permute.xlu1 %370  ;;  %v459_v35 = vadd.f32 %v443_v28, %v343_v23 }
  0xfe   : >> { %v419_v8 = vsub.f32 %v371_v5, %v1313_v38  ;;  %v727_v5 = vld [vmem:[%s1571_s1 + $0x30] sm:$0xff] }
 0x100   : >> { %v435_v13 = vmul.f32 %v419_v8, %v419_v8  ;;  %v729_v8 = vld [vmem:[%s1571_s1 + $0x40] sm:$0xff] }
 0x102   : >> { %v451_v16 = vadd.f32 %v435_v13, %v335_v12  ;;  %v267_v17 = vpop.permute.xlu1 %266  ;;  %v730_v12 = vld [vmem:[%s1571_s1 + $0x48] sm:$0xff] }
 0x103   : >> { %v320_v26 = vsub.f32 %v267_v17, %v1316_v39 }
 0x104   : >> { %v1408_v18 = vadd.f32 %v551_v14, %v451_v16  ;;  %v1113_v16 = vpack.c.bf16 %v730_v12, %v729_v8 }
 0x105   : >> { %v336_v6 = vmul.f32 %v320_v26, %v320_v26 }
 0x106   : >> { %v307_v19 = vpop.permute.xlu1 %306  ;;  %589 = vmin.xlane.f32.xlu0 %v1408_v18 }
 0x107   : >> { %v328_v27 = vsub.f32 %v307_v19, %v1316_v39  ;;  %v452_v48 = vadd.f32 %v436_v45, %v336_v6  ;;  %v731_v19 = vld [vmem:[%s1571_s1 + $0x50] sm:$0xff] }
 0x109   : >> { %v344_v37 = vmul.f32 %v328_v27, %v328_v27 }
 0x10b   : >> { %v407_v21 = vpop.permute.xlu1 %406 }
 0x10c   : >> { %v428_v22 = vsub.f32 %v407_v21, %v1313_v38 }
 0x10e   : >> { %v444_v31 = vmul.f32 %v428_v22, %v428_v22 }
 0x110   : >> { %v519_v32 = vpop.permute.xlu1 %518  ;;  %v460_v29 = vadd.f32 %v444_v31, %v344_v37  ;;  %v735_v31 = vld [vmem:[%s1571_s1 + $0x70] sm:$0xff] }
 0x111   : >> { %v543_v33 = vsub.f32 %v519_v32, %v1321_v42 }
 0x112   : >> { %v1427_v10 = vadd.f32 %v560_v47, %v460_v29 }
 0x113   : >> { %v559_v43 = vmul.f32 %v543_v33, %v543_v33 }
 0x114   : >> { %v491_v44 = vpop.permute.xlu1 %490 }
 0x115   : >> { %v536_v40 = vsub.f32 %v491_v44, %v1321_v42  ;;  %v1422_v39 = vadd.f32 %v559_v43, %v459_v35  ;;  %v722_v42 = vld [vmem:[%s1571_s1 + $0x8] sm:$0xff] }
 0x116   : >> { %v1097_v51 = vpack.c.bf16 %v722_v42, %v721_v2 }
 0x117   : >> { %v552_v49 = vmul.f32 %v536_v40, %v536_v40  ;;  %605 = vmin.xlane.f32.xlu1 %v1422_v39 }
 0x118   : >> { %1098 = vmatprep.subr.bf16.mxu0 %v1097_v51  ;;  %1129 = vmatprep.subr.bf16.mxu1 %v1097_v51 }
 0x119   : >> { %v1425_v38 = vadd.f32 %v552_v49, %v452_v48  ;;  %1100 = vmatpush3.bf16.msra.mxu0 %v1097_v51  ;;  %1137 = vmatpush3.bf16.msra.mxu1 %v1097_v51  ;;  %v1206_v49 = vmov 1.0  }
 0x11a   : >> { %1102 = vmatprep.subr.bf16.mxu0 %v1101_v55  ;;  %1130 = vmatprep.subr.bf16.mxu1 %v1101_v55 }
 0x11b   : >> { %591 = vmin.xlane.f32.xlu0 %v1425_v38  ;;  %607 = vmin.xlane.f32.xlu1 %v1427_v10 }
 0x11d   : >> { %1104 = vmatpush3.bf16.msra.mxu0 %v1101_v55  ;;  %1138 = vmatpush3.bf16.msra.mxu1 %v1101_v55 }
 0x11e   : >> { %1106 = vmatprep.subr.bf16.mxu0 %v1105_v63  ;;  %1131 = vmatprep.subr.bf16.mxu1 %v1105_v63 }
 0x121   : >> { %1108 = vmatpush3.bf16.msra.mxu0 %v1105_v63  ;;  %1139 = vmatpush3.bf16.msra.mxu1 %v1105_v63 }
 0x146   : >> { %v578_v57 = vpop.xlane.xlu1 %577 }
 0x147   : >> { %vm609_vm0 = vcmp.le.f32.partialorder %v1329_v62, %v578_v57  ;;  %v728_v62 = vld [vmem:[%s1571_s1 + $0x38] sm:$0xff] }
 0x148   : >> { %v625_v58 = vsel %vm609_vm0, %v1246_v3, 128.0  ;;  %v1109_v7 = vpack.c.bf16 %v728_v62, %v727_v5 }
 0x149   : >> { %641 = vmin.xlane.f32.xlu0 %v625_v58 }
 0x14a   : >> { %v596_v13 = vpop.xlane.xlu1 %595  ;;  %1110 = vmatprep.subr.bf16.mxu0 %v1109_v7  ;;  %1132 = vmatprep.subr.bf16.mxu1 %v1109_v7 }
 0x14b   : >> { %vm618_vm2 = vcmp.le.f32.partialorder %v1334_v4, %v596_v13  ;;  %1112 = vmatpush3.bf16.msra.mxu0 %v1109_v7  ;;  %1140 = vmatpush3.bf16.msra.mxu1 %v1109_v7  ;;  %v734_v4 = vld [vmem:[%s1571_s1 + $0x68] sm:$0xff] }
 0x14c   : >> { %1114 = vmatprep.subr.bf16.mxu0 %v1113_v16  ;;  %1133 = vmatprep.subr.bf16.mxu1 %v1113_v16  ;;  %v634_v22 = vsel %vm618_vm2, %v1246_v3, 128.0  ;;  %v1121_v27 = vpack.c.bf16 %v734_v4, %v733_v24 }
 0x14f   : >> { %1116 = vmatpush3.bf16.msra.mxu0 %v1113_v16  ;;  %1141 = vmatpush3.bf16.msra.mxu1 %v1113_v16 }
 0x15c   : >> { %v594_v14 = vpop.xlane.xlu0 %593 }
 0x15d   : >> { %vm617_vm1 = vcmp.le.f32.partialorder %v1355_v46, %v594_v14  ;;  %v1117_v46 = vpack.c.bf16 %v732_v20, %v731_v19 }
 0x15e   : >> { %v633_v17 = vsel %vm617_vm1, %v1246_v3, 128.0  ;;  %v598_v21 = vpop.xlane.xlu1 %597 }
 0x15f   : >> { %657 = vmin.xlane.f32.xlu1 %v633_v17  ;;  %vm619_vm4 = vcmp.le.f32.partialorder %v1360_v52, %v598_v21  ;;  %1118 = vmatprep.subr.bf16.mxu0 %v1117_v46 }
 0x160   : >> { %v580_v41 = vpop.xlane.xlu0 %579  ;;  %1134 = vmatprep.subr.bf16.mxu1 %v1117_v46  ;;  %v635_v32 = vsel %vm619_vm4, %v1246_v3, 128.0  ;;  %1120 = vmatpush3.bf16.msra.mxu0 %v1117_v46 }
 0x161   : >> { %vm610_vm3 = vcmp.le.f32.partialorder %v1362_v54, %v580_v41  ;;  %1142 = vmatpush3.bf16.msra.mxu1 %v1117_v46  ;;  %1122 = vmatprep.subr.bf16.mxu0 %v1121_v27 }
 0x162   : >> { %v626_v23 = vsel %vm610_vm3, %v1246_v3, 128.0  ;;  %1135 = vmatprep.subr.bf16.mxu1 %v1121_v27 }
 0x163   : >> { %659 = vmin.xlane.f32.xlu1 %v634_v22  ;;  %643 = vmin.xlane.f32.xlu0 %v626_v23 }
 0x164   : >> { %v600_v26 = vpop.xlane.xlu1 %599  ;;  %v582_v54 = vpop.xlane.xlu0 %581  ;;  %1124 = vmatpush3.bf16.msra.mxu0 %v1121_v27 }
 0x165   : >> { %vm611_vm5 = vcmp.le.f32.partialorder %v1368_v9, %v582_v54  ;;  %vm620_vm6 = vcmp.le.f32.partialorder %v1370_v11, %v600_v26  ;;  %v736_v11 = vld [vmem:[%s1571_s1 + $0x78] sm:$0xff]  ;;  %1143 = vmatpush3.bf16.msra.mxu1 %v1121_v27 }
 0x166   : >> { %v627_v28 = vsel %vm611_vm5, %v1246_v3, 128.0  ;;  %v636_v9 = vsel %vm620_vm6, %v1246_v3, 128.0  ;;  %v1125_v33 = vpack.c.bf16 %v736_v11, %v735_v31 }
 0x167   : >> { %661 = vmin.xlane.f32.xlu1 %v635_v32  ;;  %645 = vmin.xlane.f32.xlu0 %v627_v28 }
 0x168   : >> { %v584_v52 = vpop.xlane.xlu0 %583  ;;  %1126 = vmatprep.subr.bf16.mxu0 %v1125_v33  ;;  %1136 = vmatprep.subr.bf16.mxu1 %v1125_v33 }
 0x169   : >> { %vm612_vm7 = vcmp.le.f32.partialorder %v1374_v15, %v584_v52  ;;  %1128 = vmatpush3.bf16.msra.mxu0 %v1125_v33  ;;  %1144 = vmatpush3.bf16.msra.mxu1 %v1125_v33 }
 0x16a   : >> { %v628_v30 = vsel %vm612_vm7, %v1246_v3, 128.0 }
 0x16b   : >> { %663 = vmin.xlane.f32.xlu1 %v636_v9  ;;  %647 = vmin.xlane.f32.xlu0 %v628_v30 }
 0x172   : >> { %v602_v15 = vpop.xlane.xlu1 %601 }
 0x173   : >> { %vm621_vm8 = vcmp.le.f32.partialorder %v1381_v25, %v602_v15 }
 0x174   : >> { %v637_v34 = vsel %vm621_vm8, %v1246_v3, 128.0 }
 0x175   : >> { %665 = vmin.xlane.f32.xlu1 %v637_v34 }
 0x17f   : >> { %v586_v35 = vpop.xlane.xlu0 %585 }
 0x180   : >> { %vm613_vm9 = vcmp.le.f32.partialorder %v1394_v36, %v586_v35 }
 0x181   : >> { %v629_v6 = vsel %vm613_vm9, %v1246_v3, 128.0 }
 0x182   : >> { %649 = vmin.xlane.f32.xlu0 %v629_v6 }
 0x183   : >> { %v588_v37 = vpop.xlane.xlu0 %587 }
 0x184   : >> { %vm614_vm10 = vcmp.le.f32.partialorder %v1398_v56, %v588_v37 }
 0x185   : >> { %v630_v43 = vsel %vm614_vm10, %v1246_v3, 128.0 }
 0x186   : >> { %651 = vmin.xlane.f32.xlu0 %v630_v43 }
 0x187   : >> { %v604_v44 = vpop.xlane.xlu1 %603 }
 0x188   : >> { %vm622_vm11 = vcmp.le.f32.partialorder %v1401_v60, %v604_v44 }
 0x189   : >> { %v638_v25 = vsel %vm622_vm11, %v1246_v3, 128.0 }
 0x18a   : >> { %667 = vmin.xlane.f32.xlu1 %v638_v25 }
 0x193   : >> { %v590_v45 = vpop.xlane.xlu0 %589 }
 0x194   : >> { %vm615_vm12 = vcmp.le.f32.partialorder %v1408_v18, %v590_v45 }
 0x195   : >> { %v631_v36 = vsel %vm615_vm12, %v1246_v3, 128.0 }
 0x196   : >> { %653 = vmin.xlane.f32.xlu0 %v631_v36 }
 0x1a4   : >> { %v606_v29 = vpop.xlane.xlu1 %605 }
 0x1a5   : >> { %vm623_vm13 = vcmp.le.f32.partialorder %v1422_v39, %v606_v29 }
 0x1a6   : >> { %v639_v56 = vsel %vm623_vm13, %v1246_v3, 128.0 }
 0x1a7   : >> { %669 = vmin.xlane.f32.xlu1 %v639_v56 }
 0x1a8   : >> { %v608_v40 = vpop.xlane.xlu1 %607  ;;  %v592_v47 = vpop.xlane.xlu0 %591 }
 0x1a9   : >> { %vm624_vm14 = vcmp.le.f32.partialorder %v1427_v10, %v608_v40  ;;  %vm616_vm15 = vcmp.le.f32.partialorder %v1425_v38, %v592_v47 }
 0x1aa   : >> { %v640_v60 = vsel %vm624_vm14, %v1246_v3, 128.0  ;;  %v632_v48 = vsel %vm616_vm15, %v1246_v3, 128.0 }
 0x1ab   : >> { %671 = vmin.xlane.f32.xlu1 %v640_v60  ;;  %655 = vmin.xlane.f32.xlu0 %v632_v48 }
 0x1d6   : >> { %v642_v18 = vpop.xlane.xlu0 %641 }
 0x1d7   : >> { %vm673_vm0 = vcmp.eq.f32.partialorder %v1246_v3, %v642_v18 }
 0x1d8   : >> { %1073 = vmatprep.mubr.msk.f32.mxu0 %vm673_vm0, %v1206_v49  ;;  %vm883_vm0 = vcmask 23552  }
 0x1ec   : >> { %v658_v39 = vpop.xlane.xlu1 %657 }
 0x1ed   : >> { %vm681_vm1 = vcmp.eq.f32.partialorder %v1246_v3, %v658_v39 }
 0x1ee   : >> { %1085 = vmatprep.mubr.msk.f32.mxu1 %vm681_vm1, %v1206_v49 }
 0x1f0   : >> { %v660_v2 = vpop.xlane.xlu1 %659  ;;  %v644_v42 = vpop.xlane.xlu0 %643 }
 0x1f1   : >> { %vm682_vm2 = vcmp.eq.f32.partialorder %v1246_v3, %v660_v2  ;;  %vm674_vm3 = vcmp.eq.f32.partialorder %v1246_v3, %v644_v42 }
 0x1f2   : >> { %1074 = vmatmul.mubr.msk.f32.vlgmr.msra.gmra.mrb[0].mxu0 %vm674_vm3, %v1206_v49  ;;  %1086 = vmatmul.mubr.msk.f32.vlgmr.msra.gmra.mrb[0].mxu1 %vm682_vm2, %v1206_v49 }
 0x1f4   : >> { %v662_v38 = vpop.xlane.xlu1 %661  ;;  %v646_v10 = vpop.xlane.xlu0 %645 }
 0x1f5   : >> { %vm683_vm4 = vcmp.eq.f32.partialorder %v1246_v3, %v662_v38  ;;  %vm675_vm5 = vcmp.eq.f32.partialorder %v1246_v3, %v646_v10 }
 0x1f6   : >> { %1076 = vmatprep.mubr.msk.f32.mxu0 %vm675_vm5, %v1206_v49  ;;  %1088 = vmatprep.mubr.msk.f32.mxu1 %vm683_vm4, %v1206_v49 }
 0x1f8   : >> { %v664_v50 = vpop.xlane.xlu1 %663  ;;  %v648_v51 = vpop.xlane.xlu0 %647 }
 0x1f9   : >> { %vm684_vm6 = vcmp.eq.f32.partialorder %v1246_v3, %v664_v50  ;;  %vm676_vm7 = vcmp.eq.f32.partialorder %v1246_v3, %v648_v51 }
 0x1fa   : >> { %1077 = vmatmul.mubr.msk.f32.gmra.mrb[2].mxu0 %vm676_vm7, %v1206_v49  ;;  %1089 = vmatmul.mubr.msk.f32.gmra.mrb[2].mxu1 %vm684_vm6, %v1206_v49 }
 0x202   : >> { %v666_v53 = vpop.xlane.xlu1 %665 }
 0x203   : >> { %vm685_vm8 = vcmp.eq.f32.partialorder %v1246_v3, %v666_v53 }
 0x204   : >> { %1091 = vmatprep.mubr.msk.f32.mxu1 %vm685_vm8, %v1206_v49 }
 0x20f   : >> { %v650_v55 = vpop.xlane.xlu0 %649 }
 0x210   : >> { %vm677_vm9 = vcmp.eq.f32.partialorder %v1246_v3, %v650_v55 }
 0x211   : >> { %1079 = vmatprep.mubr.msk.f32.mxu0 %vm677_vm9, %v1206_v49 }
 0x213   : >> { %v652_v57 = vpop.xlane.xlu0 %651 }
 0x214   : >> { %vm678_vm10 = vcmp.eq.f32.partialorder %v1246_v3, %v652_v57 }
 0x215   : >> { %1080 = vmatmul.mubr.msk.f32.gmra.mrb[4].mxu0 %vm678_vm10, %v1206_v49 }
 0x217   : >> { %v668_v58 = vpop.xlane.xlu1 %667 }
 0x218   : >> { %vm686_vm11 = vcmp.eq.f32.partialorder %v1246_v3, %v668_v58 }
 0x219   : >> { %1092 = vmatmul.mubr.msk.f32.gmra.mrb[4].mxu1 %vm686_vm11, %v1206_v49 }
 0x223   : >> { %v654_v59 = vpop.xlane.xlu0 %653 }
 0x224   : >> { %vm679_vm12 = vcmp.eq.f32.partialorder %v1246_v3, %v654_v59 }
 0x225   : >> { %1082 = vmatprep.mubr.msk.f32.mxu0 %vm679_vm12, %v1206_v49 }
 0x234   : >> { %v670_v61 = vpop.xlane.xlu1 %669 }
 0x235   : >> { %vm687_vm13 = vcmp.eq.f32.partialorder %v1246_v3, %v670_v61 }
 0x236   : >> { %1094 = vmatprep.mubr.msk.f32.mxu1 %vm687_vm13, %v1206_v49 }
 0x238   : >> { %v672_v63 = vpop.xlane.xlu1 %671  ;;  %v656_v5 = vpop.xlane.xlu0 %655 }
 0x239   : >> { %vm688_vm14 = vcmp.eq.f32.partialorder %v1246_v3, %v672_v63  ;;  %vm680_vm15 = vcmp.eq.f32.partialorder %v1246_v3, %v656_v5 }
 0x23a   : >> { %1083 = vmatmul.mubr.msk.f32.gmra.mrb[6].mxu0 %vm680_vm15, %v1206_v49  ;;  %1095 = vmatmul.mubr.msk.f32.gmra.mrb[6].mxu1 %vm688_vm14, %v1206_v49 }
 0x2c5   : >> { %v1075_v62 = vpop.f32.mrb[0].mxu0  ;;  %v1087_v7 = vpop.f32.mrb[0].mxu1 }
 0x2c6   : >> { %885 = vst.msk [vmem:[%s1530_s13 + $0x8] sm:$0xff] %vm883_vm0, %v1075_v62  ;;  %893 = vst.msk [vmem:[%s1530_s13 + $0x48] sm:$0xff] %vm883_vm0, %v1087_v7  ;;  %v803_v8 = vpop.f32.mrb[1].mxu0  ;;  %v843_v12 = vpop.f32.mrb[1].mxu1 }
 0x2c7   : >> { %884 = vst.msk [vmem:[%s1530_s13] sm:$0xff] %vm883_vm0, %v803_v8  ;;  %892 = vst.msk [vmem:[%s1530_s13 + $0x40] sm:$0xff] %vm883_vm0, %v843_v12 }
 0x2cd   : >> { %v1078_v13 = vpop.f32.mrb[2].mxu0  ;;  %v1090_v14 = vpop.f32.mrb[2].mxu1 }
 0x2ce   : >> { %887 = vst.msk [vmem:[%s1530_s13 + $0x18] sm:$0xff] %vm883_vm0, %v1078_v13  ;;  %895 = vst.msk [vmem:[%s1530_s13 + $0x58] sm:$0xff] %vm883_vm0, %v1090_v14  ;;  %v813_v16 = vpop.f32.mrb[3].mxu0  ;;  %v853_v17 = vpop.f32.mrb[3].mxu1 }
 0x2cf   : >> { %886 = vst.msk [vmem:[%s1530_s13 + $0x10] sm:$0xff] %vm883_vm0, %v813_v16  ;;  %894 = vst.msk [vmem:[%s1530_s13 + $0x50] sm:$0xff] %vm883_vm0, %v853_v17 }
 0x2e8   : >> { %v1081_v19 = vpop.f32.mrb[4].mxu0 }
 0x2e9   : >> { %889 = vst.msk [vmem:[%s1530_s13 + $0x28] sm:$0xff] %vm883_vm0, %v1081_v19  ;;  %v823_v20 = vpop.f32.mrb[5].mxu0 }
 0x2ea   : >> { %888 = vst.msk [vmem:[%s1530_s13 + $0x20] sm:$0xff] %vm883_vm0, %v823_v20 }
 0x2ec   : >> { %v1093_v21 = vpop.f32.mrb[4].mxu1 }
 0x2ed   : >> { %897 = vst.msk [vmem:[%s1530_s13 + $0x68] sm:$0xff] %vm883_vm0, %v1093_v21  ;;  %v863_v41 = vpop.f32.mrb[5].mxu1 }
 0x2ee   : >> { %896 = vst.msk [vmem:[%s1530_s13 + $0x60] sm:$0xff] %vm883_vm0, %v863_v41 }
 0x309   : > { %209 = sbr.rel (!%p207_p4) target bundleno = 16 (0x10), region = 75 }
 0x30d   : >> { %v1084_v46 = vpop.f32.mrb[6].mxu0  ;;  %v1096_v22 = vpop.f32.mrb[6].mxu1 }
 0x30e   : >> { %891 = vst.msk [vmem:[%s1530_s13 + $0x38] sm:$0xff] %vm883_vm0, %v1084_v46  ;;  %899 = vst.msk [vmem:[%s1530_s13 + $0x78] sm:$0xff] %vm883_vm0, %v1096_v22  ;;  %v833_v23 = vpop.f32.mrb[7].mxu0  ;;  %v873_v24 = vpop.f32.mrb[7].mxu1 }
 0x30f   : >> { %890 = vst.msk [vmem:[%s1530_s13 + $0x30] sm:$0xff] %vm883_vm0, %v833_v23  ;;  %898 = vst.msk [vmem:[%s1530_s13 + $0x70] sm:$0xff] %vm883_vm0, %v873_v24 }
 0x310 PF: > { %s14_s15 = sadd.s32 1, %s1197_s15  }
 0x311   : > { %p11_p5 = scmp.ge.s32.totalorder %s14_s15, 4  }
 0x313   :  { %13 = sbr.rel (!%p11_p5) target bundleno = 1 (0x1), region = 86 }

</bundles_post_ra>
